<compile_context>
chip_gen: v5e
topology: v5e:2x2
jax: 0.10.0
libtpu: 0.0.40
codegen_flags: <defaults>
</compile_context>

<pallas_src>
import functools

import jax
import jax.numpy as jnp
from jax.experimental import pallas as pl
from jax.experimental.pallas import tpu as pltpu

ALPHA = 0.25
GAMMA = 2                      # hard-coded: |label - logits|**2 is a plain square
LANE = 128
SUBLANE = 8
CHUNK = SUBLANE * LANE         # 1024-element alignment unit of the kernel path
DEFAULT_BLOCK_ROWS = 8192      # (8192,128) f32 = 4 MiB per input block
STRIP_ROWS = 1024              # in-kernel strip: bounds elementwise temporaries
NUM_CORES = 2                  # "parallel" axis; 2 TCs on v7x, harmless elsewhere
VMEM_LIMIT_BYTES = 48 * 1024 * 1024


def _pointwise_loss(x, y):
    """Per-element focal loss (f32), algebraically simplified.

    log_sigmoid(x)      = min(x, 0) - log1p(exp(-|x|))
    log(1 - sigmoid(x)) = log_sigmoid(x) - x
    loss = -(y-x)^2 * [ a*y*log_p + (1-a)*(1-y)*(log_p - x) ]
         =  (y-x)^2 * [ (1-a)*(1-y)*x - (a*y + (1-a)*(1-y))*log_p ]
    """
    log_p = jnp.minimum(x, 0.0) - jnp.log1p(jnp.exp(-jnp.abs(x)))
    d = y - x
    w_x = (1.0 - ALPHA) - (1.0 - ALPHA) * y          # (1-a)*(1-y)
    w_p = (1.0 - ALPHA) - (1.0 - 2.0 * ALPHA) * y    # a*y + (1-a)*(1-y)
    return (d * d) * (w_x * x - w_p * log_p)


def _focal_loss_kernel(logits_ref, label_ref, out_ref, acc_ref, *,
                       total_rows, num_blocks, blocks_per_core,
                       block_rows, strip_rows, has_partial, has_phantom):
    c = pl.program_id(0)          # parallel (core) axis
    j = pl.program_id(1)          # arbitrary (reduction) axis
    block_id = c * blocks_per_core + j
    n_strips = block_rows // strip_rows
    vregs_per_strip = strip_rows // SUBLANE

    @pl.when(j == 0)
    def _():
        acc_ref[...] = jnp.zeros_like(acc_ref)

    def accumulate(x_raw, y_raw, start, masked):
        loss = _pointwise_loss(x_raw.astype(jnp.float32),
                               y_raw.astype(jnp.float32))
        if masked:
            # Only the partial tail block takes this path. Keep it a select
            # (never a multiply): rows past `total_rows` are stale VMEM.
            row0 = block_id * block_rows + start
            row_ids = jax.lax.broadcasted_iota(
                jnp.int32, (strip_rows, LANE), 0) + row0
            loss = jnp.where(row_ids < total_rows, loss, 0.0)
        # Vreg-shaped accumulation: whole-vreg VPU adds only, no XLU.
        acc_ref[...] += loss.reshape(vregs_per_strip, SUBLANE, LANE).sum(axis=0)

    def run_block(masked):
        if n_strips == 1:
            accumulate(logits_ref[...], label_ref[...], 0, masked)
        else:
            def body(s, carry):
                start = pl.multiple_of(s * strip_rows, strip_rows)
                accumulate(logits_ref[pl.ds(start, strip_rows), :],
                           label_ref[pl.ds(start, strip_rows), :],
                           start, masked)
                return carry
            jax.lax.fori_loop(0, n_strips, body, 0)

    if has_partial:
        # All real blocks except the last are full; phantom ids (>= num_blocks)
        # match neither guard and are skipped entirely.
        @pl.when(block_id < num_blocks - 1)
        def _():
            run_block(False)

        @pl.when(block_id == num_blocks - 1)
        def _():
            run_block(True)
    elif has_phantom:
        @pl.when(block_id < num_blocks)
        def _():
            run_block(False)
    else:
        run_block(False)

    @pl.when(j == pl.num_programs(1) - 1)
    def _():
        out_ref[0] = acc_ref[...]


def focal_loss(logits, label, reduction="mean"):
    """Focal loss matching the PyTorch FocalLoss module (mean / sum reductions).

    bf16 logits/labels are supported directly (upcast inside VMEM) and halve
    HBM traffic; pass them as bf16 — no wrapper cast is added here.
    """
    assert logits.shape == label.shape
    if reduction not in ("mean", "sum"):
        # TODO(synk): reduction='none' (elementwise output) not implemented in the kernel path.
        raise ValueError("only 'mean' / 'sum' reductions implemented in the kernel path")

    n_elems = logits.size
    flat_logits = logits.reshape(-1)
    flat_label = label.reshape(-1)

    n_main = (n_elems // CHUNK) * CHUNK
    tail = jnp.float32(0.0)
    if n_main < n_elems:
        # Ragged remainder (< 1024 elements): tiny pure-JAX sum instead of a
        # full-array jnp.pad copy of both inputs.
        tail = jnp.sum(_pointwise_loss(
            flat_logits[n_main:].astype(jnp.float32),
            flat_label[n_main:].astype(jnp.float32)))

    if n_main == 0:
        total = tail
    else:
        main_logits = flat_logits if n_main == n_elems else flat_logits[:n_main]
        main_label = flat_label if n_main == n_elems else flat_label[:n_main]
        rows = n_main // LANE                      # multiple of SUBLANE
        logits2d = main_logits.reshape(rows, LANE)
        label2d = main_label.reshape(rows, LANE)

        if rows >= DEFAULT_BLOCK_ROWS:
            block_rows = DEFAULT_BLOCK_ROWS
        elif rows >= STRIP_ROWS:
            block_rows = (rows // STRIP_ROWS) * STRIP_ROWS   # multiple of 1024 (and 16)
        else:
            block_rows = rows                      # small input: full extent
        strip_rows = STRIP_ROWS if block_rows % STRIP_ROWS == 0 else block_rows

        num_blocks = pl.cdiv(rows, block_rows)
        blocks_per_core = pl.cdiv(num_blocks, NUM_CORES)
        has_partial = (rows % block_rows) != 0
        has_phantom = NUM_CORES * blocks_per_core != num_blocks

        def row_block_index(c, j):
            # Clamp phantom iterations back in range; their compute is skipped
            # in-kernel (cost: at most one redundant block DMA).
            return (jnp.minimum(c * blocks_per_core + j, num_blocks - 1), 0)

        kernel = functools.partial(
            _focal_loss_kernel,
            total_rows=rows,
            num_blocks=num_blocks,
            blocks_per_core=blocks_per_core,
            block_rows=block_rows,
            strip_rows=strip_rows,
            has_partial=has_partial,
            has_phantom=has_phantom,
        )

        partials = pl.pallas_call(
            kernel,
            out_shape=jax.ShapeDtypeStruct((NUM_CORES, SUBLANE, LANE), jnp.float32),
            grid_spec=pltpu.PrefetchScalarGridSpec(
                num_scalar_prefetch=0,
                grid=(NUM_CORES, blocks_per_core),
                in_specs=[
                    pl.BlockSpec((block_rows, LANE), row_block_index),
                    pl.BlockSpec((block_rows, LANE), row_block_index),
                ],
                out_specs=pl.BlockSpec((1, SUBLANE, LANE), lambda c, j: (c, 0, 0)),
                scratch_shapes=[pltpu.VMEM((SUBLANE, LANE), jnp.float32)],
            ),
            compiler_params=pltpu.CompilerParams(
                # TODO(synk): on v7x verify "parallel" shards across the 2 TCs;
                # if not, switch the leading axis to pltpu.CORE_PARALLEL.
                dimension_semantics=("parallel", "arbitrary"),
                vmem_limit_bytes=VMEM_LIMIT_BYTES,
            ),
        )(logits2d, label2d)
        total = jnp.sum(partials) + tail

    if reduction == "mean":
        return total / jnp.float32(n_elems)
    return total


def _focal_loss_ref(logits, label, reduction="mean"):
    # Straightforward (unsimplified) reference matching the PyTorch module.
    x = logits.astype(jnp.float32)
    y = label.astype(jnp.float32)
    coeff = -jnp.abs(y - x) ** GAMMA
    log1p_e = jnp.log1p(jnp.exp(-jnp.abs(x)))
    log_probs = jnp.minimum(x, 0.0) - log1p_e
    log_1_probs = jnp.minimum(-x, 0.0) - log1p_e
    loss = (y * ALPHA * log_probs + (1.0 - y) * (1.0 - ALPHA) * log_1_probs) * coeff
    if reduction == "mean":
        return jnp.mean(loss)
    return jnp.sum(loss)


if __name__ == "__main__":
    key = jax.random.PRNGKey(0)
    k1, k2, k3, k4 = jax.random.split(key, 4)

    # Primary small shape implied by the module usage: (B, C, H, W).
    B, C, H, W = 2, 4, 16, 16
    logits = jax.random.normal(k1, (B, C, H, W), dtype=jnp.float32)
    label = jax.random.bernoulli(k2, 0.5, (B, C, H, W)).astype(jnp.float32)

    out = jax.block_until_ready(focal_loss(logits, label, reduction="mean"))
    ref = _focal_loss_ref(logits, label, reduction="mean")
    assert jnp.allclose(out, ref, rtol=1e-5, atol=1e-6), (out, ref)

    # Ragged shape: exercises the aligned-prefix kernel path + pure-JAX tail.
    logits2 = jax.random.normal(k3, (2, 3, 17, 19), dtype=jnp.float32)
    label2 = jax.random.bernoulli(k4, 0.5, (2, 3, 17, 19)).astype(jnp.float32)
    out2 = jax.block_until_ready(focal_loss(logits2, label2, reduction="sum"))
    ref2 = _focal_loss_ref(logits2, label2, reduction="sum")
    assert jnp.allclose(out2, ref2, rtol=1e-5, atol=1e-5), (out2, ref2)

    print("KERNEL_OK")
</pallas_src>

<mosaic_0001>
module attributes {stable_mosaic.version = 11 : i64} {
  func.func @_focal_loss_kernel(%arg0: i32, %arg1: i32, %arg2: memref<16x128xf32, #tpu.memory_space<vmem>>, %arg3: memref<16x128xf32, #tpu.memory_space<vmem>>, %arg4: memref<1x8x128xf32, #tpu.memory_space<vmem>>, %arg5: memref<8x128xf32, #tpu.memory_space<vmem>>) attributes {dimension_semantics = [#tpu.dimension_semantics<parallel>, #tpu.dimension_semantics<arbitrary>], iteration_bounds = array<i64: 2, 1>, scalar_prefetch = 0 : i64, scratch_operands = 1 : i64, tpu.core_type = #tpu.core_type<tc>, window_params = [{transform_indices = @transform_0, window_bounds = array<i64: 16, 128>}, {transform_indices = @transform_1, window_bounds = array<i64: 16, 128>}, {transform_indices = @transform_2, window_bounds = array<i64: 1, 8, 128>}]} {
    %c1_i32 = arith.constant 1 : i32
    %0 = arith.muli %arg0, %c1_i32 : i32
    %1 = arith.addi %0, %arg1 : i32
    %c0_i32 = arith.constant 0 : i32
    %2 = arith.cmpi eq, %arg1, %c0_i32 : i32
    %3 = arith.extui %2 : i1 to i32
    %c0_i32_0 = arith.constant 0 : i32
    %4 = arith.cmpi ne, %3, %c0_i32_0 : i32
    scf.if %4 {
      %cst = arith.constant 0.000000e+00 : f32
      %11 = vector.broadcast %cst : f32 to vector<8x128xf32>
      %c0 = arith.constant 0 : index
      %c0_5 = arith.constant 0 : index
      %12 = vector.load %arg5[%c0, %c0_5] : memref<8x128xf32, #tpu.memory_space<vmem>>, vector<8x128xf32>
      tpu.vector_store %arg5[%c0, %c0_5], %11 {strides = array<i32>} : memref<8x128xf32, #tpu.memory_space<vmem>>, vector<8x128xf32>,
    } else {
    }
    %c1_i32_1 = arith.constant 1 : i32
    %5 = arith.cmpi slt, %1, %c1_i32_1 : i32
    %6 = arith.extui %5 : i1 to i32
    %c0_i32_2 = arith.constant 0 : i32
    %7 = arith.cmpi ne, %6, %c0_i32_2 : i32
    scf.if %7 {
      %c0 = arith.constant 0 : index
      %c0_5 = arith.constant 0 : index
      %11 = vector.load %arg2[%c0, %c0_5] : memref<16x128xf32, #tpu.memory_space<vmem>>, vector<16x128xf32>
      %c0_6 = arith.constant 0 : index
      %c0_7 = arith.constant 0 : index
      %12 = vector.load %arg3[%c0_6, %c0_7] : memref<16x128xf32, #tpu.memory_space<vmem>>, vector<16x128xf32>
      %cst = arith.constant 0.000000e+00 : f32
      %13 = vector.broadcast %cst : f32 to vector<16x128xf32>
      %14 = arith.minimumf %11, %13 : vector<16x128xf32>
      %15 = math.absf %11 : vector<16x128xf32>
      %cst_8 = arith.constant 0.000000e+00 : f32
      %16 = vector.broadcast %cst_8 : f32 to vector<16x128xf32>
      %17 = arith.subf %16, %15 : vector<16x128xf32>
      %18 = math.exp %17 : vector<16x128xf32>
      %19 = math.log1p %18 : vector<16x128xf32>
      %20 = arith.subf %14, %19 : vector<16x128xf32>
      %21 = arith.subf %12, %11 : vector<16x128xf32>
      %cst_9 = arith.constant 7.500000e-01 : f32
      %22 = vector.broadcast %cst_9 : f32 to vector<16x128xf32>
      %23 = arith.mulf %22, %12 : vector<16x128xf32>
      %cst_10 = arith.constant 7.500000e-01 : f32
      %24 = vector.broadcast %cst_10 : f32 to vector<16x128xf32>
      %25 = arith.subf %24, %23 : vector<16x128xf32>
      %cst_11 = arith.constant 5.000000e-01 : f32
      %26 = vector.broadcast %cst_11 : f32 to vector<16x128xf32>
      %27 = arith.mulf %26, %12 : vector<16x128xf32>
      %cst_12 = arith.constant 7.500000e-01 : f32
      %28 = vector.broadcast %cst_12 : f32 to vector<16x128xf32>
      %29 = arith.subf %28, %27 : vector<16x128xf32>
      %30 = arith.mulf %21, %21 : vector<16x128xf32>
      %31 = arith.mulf %25, %11 : vector<16x128xf32>
      %32 = arith.mulf %29, %20 : vector<16x128xf32>
      %33 = arith.subf %31, %32 : vector<16x128xf32>
      %34 = arith.mulf %30, %33 : vector<16x128xf32>
      %c0_13 = arith.constant 0 : index
      %c0_14 = arith.constant 0 : index
      %35 = vector.load %arg5[%c0_13, %c0_14] : memref<8x128xf32, #tpu.memory_space<vmem>>, vector<8x128xf32>
      %36 = vector.shape_cast %34 : vector<16x128xf32> to vector<2x8x128xf32>
      %cst_15 = arith.constant dense<0.000000e+00> : vector<8x128xf32>
      %37 = vector.multi_reduction <add>, %36, %cst_15 [0] : vector<2x8x128xf32> to vector<8x128xf32>
      %38 = arith.addf %35, %37 : vector<8x128xf32>
      %c0_16 = arith.constant 0 : index
      %c0_17 = arith.constant 0 : index
      %39 = vector.load %arg5[%c0_16, %c0_17] : memref<8x128xf32, #tpu.memory_space<vmem>>, vector<8x128xf32>
      tpu.vector_store %arg5[%c0_16, %c0_17], %38 {strides = array<i32>} : memref<8x128xf32, #tpu.memory_space<vmem>>, vector<8x128xf32>,
    } else {
    }
    %c0_i32_3 = arith.constant 0 : i32
    %8 = arith.cmpi eq, %arg1, %c0_i32_3 : i32
    %9 = arith.extui %8 : i1 to i32
    %c0_i32_4 = arith.constant 0 : i32
    %10 = arith.cmpi ne, %9, %c0_i32_4 : i32
    scf.if %10 {
      %c0 = arith.constant 0 : index
      %c0_5 = arith.constant 0 : index
      %11 = vector.load %arg5[%c0, %c0_5] : memref<8x128xf32, #tpu.memory_space<vmem>>, vector<8x128xf32>
      %c0_6 = arith.constant 0 : index
      %c0_7 = arith.constant 0 : index
      %c0_8 = arith.constant 0 : index
      %12 = vector.load %arg4[%c0_6, %c0_7, %c0_8] : memref<1x8x128xf32, #tpu.memory_space<vmem>>, vector<1x8x128xf32>
      %13 = vector.shape_cast %12 : vector<1x8x128xf32> to vector<8x128xf32>
      %14 = vector.shape_cast %11 : vector<8x128xf32> to vector<1x8x128xf32>
      tpu.vector_store %arg4[%c0_6, %c0_7, %c0_8], %14 {strides = array<i32>} : memref<1x8x128xf32, #tpu.memory_space<vmem>>, vector<1x8x128xf32>,
    } else {
    }
    return
  }
  func.func @transform_0(%arg0: i32, %arg1: i32) -> (i32, i32) {
    %c1_i32 = arith.constant 1 : i32
    %0 = arith.muli %arg0, %c1_i32 : i32
    %1 = arith.addi %0, %arg1 : i32
    %c0_i32 = arith.constant 0 : i32
    %2 = arith.minsi %1, %c0_i32 : i32
    %c0_i32_0 = arith.constant 0 : i32
    %c0_i32_1 = arith.constant 0 : i32
    return %2, %c0_i32_0 : i32, i32
  }
  func.func @transform_1(%arg0: i32, %arg1: i32) -> (i32, i32) {
    %c1_i32 = arith.constant 1 : i32
    %0 = arith.muli %arg0, %c1_i32 : i32
    %1 = arith.addi %0, %arg1 : i32
    %c0_i32 = arith.constant 0 : i32
    %2 = arith.minsi %1, %c0_i32 : i32
    %c0_i32_0 = arith.constant 0 : i32
    %c0_i32_1 = arith.constant 0 : i32
    return %2, %c0_i32_0 : i32, i32
  }
  func.func @transform_2(%arg0: i32, %arg1: i32) -> (i32, i32, i32) {
    %c0_i32 = arith.constant 0 : i32
    %c0_i32_0 = arith.constant 0 : i32
    %c0_i32_1 = arith.constant 0 : i32
    return %arg0, %c0_i32, %c0_i32_0 : i32, i32, i32
  }
}

</mosaic_0001>

<bundles_post_ra>
// kernel: tpu_custom_call.1
= control target key start
LH: loop header
LB: loop body
LE: loop exit
PB: predicated region body
PF: predicated region fallthrough
CT: control target
= control target key end

     0   :  { %7 = vsyncpa [#allocation4], 0  ;;  %s926_s0 = inlined_call_operand.hbm [shape: f32[16,128], index: 0, kind: input, shape index: {}]   ;;  %s927_s1 = inlined_call_operand.hbm [shape: f32[16,128], index: 1, kind: input, shape index: {}]   ;;  %s928_s2 = inlined_call_operand.hbm [shape: f32[2,8,128], index: 2, kind: output, shape index: {}]  }
   0x1   :  { %9 = vsyncpa [#allocation4 + $0x1], 0 }
   0x2   :  { %10 = vsyncpa [#allocation7], 0 }
   0x3   :  { %12 = vsyncpa [#allocation7 + $0x1], 0 }
   0x4   :  { %13 = vsyncpa [#allocation5], 0 }
   0x5   :  { %15 = vsyncpa [#allocation5 + $0x1], 0  ;;  %s746_s9 = smov 0   ;;  %s748_s10 = smov 0  }
   0x6   :  { %s750_s11 = smov 0   ;;  %s752_s12 = smov 0  }
   0x7   :  { %s754_s13 = smov 0   ;;  %s756_s14 = smov 0  }
   0x8   :  { %s758_s15 = smov 0   ;;  %s760_s16 = smov 0  }
   0x9 LB: > { %s434_s17 = sadd.s32 4294967295, %s724_s16   ;;  %s435_s18 = sadd.s32 4294967294, %s724_s16   ;;  %s724_s16 = sphi %s760_s16, %s21_s16   ;;  %s720_s15 = sphi %s758_s15, %s940_s15   ;;  %s716_s14 = sphi %s756_s14, %s939_s14   ;;  %s712_s13 = sphi %s754_s13, %s916_s13   ;;  %s708_s12 = sphi %s752_s12, %s938_s12   ;;  %s704_s11 = sphi %s750_s11, %s937_s11   ;;  %s700_s10 = sphi %s748_s10, %s936_s10   ;;  %s696_s9 = sphi %s746_s9, %s935_s9  }
   0xa   : > { %s33_s19 = sadd.s32 1, %s720_s15  ;;  %p693_p1 = scmp.ne.s32.totalorder %s712_s13, 0 }
   0xb   : > { %p35_p0 = scmp.ge.s32.totalorder %s33_s19, 2  ;;  %p54_p2 = scmp.eq.s32.totalorder %s724_s16, 0 }
   0xc   : > { %p59_p3 = scmp.ne.s32.totalorder %s712_s13, %s708_s12  ;;  %p60_p5 = scmp.eq.s32.totalorder %s434_s17, 0 }
   0xd   : > { %s942_s19 = smov (%p35_p0, %s33_s19), 0  ;;  %p792_p4 = por %p693_p1, %p54_p2 }
   0xe   : > { %p796_p6 = por %p60_p5, %p59_p3  ;;  %s101_s22 = ssub.s32 %s720_s15, %s942_s19 }
   0xf   : > { %p102_p7 = scmp.eq.s32.totalorder %s101_s22, 0  ;;  %s104_s23 = sadd.s32 1, %s704_s11 }
  0x10   : > { %p114_p8 = scmp.ne.s32.totalorder %s704_s11, %s700_s10  ;;  %p115_p9 = scmp.eq.s32.totalorder %s434_s17, 1 }
  0x11   : > { %s804_s24 = scalar_select %p102_p7, %s704_s11, %s104_s23  }
  0x12   : > { %p120_p10 = scmp.ne.s32.totalorder %s700_s10, %s696_s9  ;;  %p121_p11 = scmp.eq.s32.totalorder %s435_s18, 1 }
  0x13   : > { %p810_p12 = por %p115_p9, %p114_p8  ;;  %p437_p13 = scmp.ge.s32.totalorder %s724_s16, 2 }
  0x14   : > { %p815_p0 = por %p121_p11, %p120_p10  ;;  %p472_p1 = scmp.lt.s32.totalorder %s724_s16, 2 }
  0x15   : > { %s154_s29 = sshll.u32 %s926_s0, 4  ;;  %s726_s30 = smov [#allocation3]   ;;  %s155_s29 = int_to_ptr.hbm [resolvable:$true] %s154_s29 }
  0x16   : > { %s156_s3 = sshll.u32 %s726_s30, 4  ;;  %p825_p2 = pnand %p472_p1, %p792_p4  ;;  %s157_s3 = int_to_ptr.vmem [resolvable:$true] %s156_s3 }
  0x17   : > { %p444_p3 = scmp.ge.s32.totalorder %s724_s16, 1  ;;  %p189_p5 = scmp.lt.s32.totalorder %s724_s16, 3 }
  0x18   : > { %s557_s5 = sshra.s32 %s155_s29, 4  ;;  %p561_p8 = pneg %p825_p2  ;;  %s558_s5 = int_to_ptr.hbm [resolvable:$true] %s557_s5 }
  0x19   : > { %s559_s6 = scalar_lea.hbm %s558_s5, 16  ;;  %s564_s12 = scalar_lea.hbm %s926_s0, 16 }
  0x1a   : > { %p560_p7 = scmp.ne.s32.totalorder %s558_s5, %s559_s6  ;;  %p566_p4 = scmp.lt.s32.totalorder %s564_s12, %s559_s6 }
  0x1c   : > { %p562_p9 = pnand %p561_p8, %p560_p7 }
  0x1e   : > { %p563_p10 = pneg %p562_p9 }
  0x20   : > { %p568_p11 = pnand %p566_p4, %p563_p10 }
  0x22   : > { %571 = shalt.err (!%p568_p11)
}
  0x23   : > { %s727_s17 = smov 128   ;;  %s728_s18 = smov 8  }
  0x24   : > { %464 = dma.hbm_to_vmem [thread:$0]  (!%p825_p2), %s155_s29, 256, %s157_s3, [#allocation4], %s727_s17, %s727_s17, %s728_s18  }
  0x25   : > { %p845_p1 = pnand %p444_p3, %p189_p5  ;;  %s179_s27 = sshll.u32 %s927_s1, 4  ;;  %s180_s27 = int_to_ptr.hbm [resolvable:$true] %s179_s27 }
  0x26   : > { %s729_s28 = smov [#allocation6]   ;;  %s587_s5 = sshra.s32 %s180_s27, 4  ;;  %s588_s5 = int_to_ptr.hbm [resolvable:$true] %s587_s5 }
  0x27   : > { %s181_s30 = sshll.u32 %s729_s28, 4  ;;  %s589_s6 = scalar_lea.hbm %s588_s5, 16  ;;  %s182_s30 = int_to_ptr.vmem [resolvable:$true] %s181_s30 }
  0x28   : > { %p590_p7 = scmp.ne.s32.totalorder %s588_s5, %s589_s6  ;;  %s594_s7 = scalar_lea.hbm %s927_s1, 16 }
  0x29   : > { %p596_p3 = scmp.lt.s32.totalorder %s594_s7, %s589_s6 }
  0x2a   : > { %p592_p9 = pnand %p590_p7, %p561_p8 }
  0x2c   : > { %p593_p10 = pneg %p592_p9 }
  0x2e   : > { %p598_p5 = pnand %p596_p3, %p593_p10 }
  0x30   : > { %601 = shalt.err (!%p598_p5)
}
  0x31   : > { %467 = dma.hbm_to_vmem [thread:$0]  (!%p825_p2), %s180_s27, 256, %s182_s30, [#allocation7], %s727_s17, %s727_s17, %s728_s18  }
  0x32   : > { %193 = sbr.rel (%p845_p1) target bundleno = 120 (0x78), region = 28  ;;  %s195_s8 = sand.u32 (!%p845_p1), 1, %s712_s13  }
  0x33   : > { %s445_s12 = sshll.u32 (!%p845_p1), %s195_s8, 4  ;;  %s196_s22 = scalar_lea.sflag (!%p845_p1), [#allocation4], %s195_s8 }
  0x34   : > { %s199_s23 = scalar_lea.vmem (!%p845_p1), [#allocation3], %s445_s12 }
  0x37   : > { %682 = dma.done.wait (%p796_p6), %s196_s22, 256  }
  0x38   : > { %684 = vsyncadd (%p796_p6), %s196_s22, 4294967040  ;;  %s206_s28 = scalar_lea.sflag [#allocation7], %s195_s8  ;;  %s209_s5 = scalar_lea.vmem [#allocation6], %s445_s12 }
  0x39   : > { %686 = dma.done.wait (%p796_p6), %s206_s28, 256  }
  0x3a   : > { %688 = vsyncadd (%p796_p6), %s206_s28, 4294967040  ;;  %s233_s4 = sand.u32 1, %s700_s10   ;;  %v730_v0 = vmov 0.0   ;;  %p448_p2 = scmp.ge.s32.totalorder %s716_s14, 1 }
  0x3b   : > { %s874_s17 = sshll.u32 %s233_s4, 3  ;;  %249 = vst [vmem:[#allocation2] sm:$0xff] %v730_v0 }
  0x3c   : > { %s235_s18 = scalar_lea.vmem [#allocation8], %s874_s17  ;;  %253 = sbr.rel (%p448_p2) target bundleno = 105 (0x69), region = 44 }
  0x41   : > { %v254_v1 = vld [vmem:[%s199_s23] sm:$0xff]  ;;  %v255_v2 = vld [vmem:[%s199_s23 + $0x8] sm:$0xff] }
  0x42   : > { %v260_v3 = vand.u32 2147483647, %v254_v1  ;;  %v261_v4 = vand.u32 2147483647, %v255_v2  ;;  %v256_v13 = vld [vmem:[%s209_s5] sm:$0xff]  ;;  %v257_v16 = vld [vmem:[%s209_s5 + $0x8] sm:$0xff] }
  0x43   : > { %v290_v20 = vmul.f32 0.75, %v256_v13  ;;  %v291_v22 = vmul.f32 0.75, %v257_v16  ;;  %v294_v23 = vmul.f32 0.5, %v256_v13  ;;  %v295_v25 = vmul.f32 0.5, %v257_v16  ;;  %v308_v53 = vld [vmem:[#allocation2] sm:$0xff] }
  0x44   : > { %v262_v5 = vsub.f32 0.0, %v260_v3  ;;  %v263_v6 = vsub.f32 0.0, %v261_v4  ;;  %v258_v27 = vmin.f32 %v254_v1, 0.0  ;;  %v259_v31 = vmin.f32 %v255_v2, 0.0 }
  0x45   : > { %v292_v29 = vsub.f32 0.75, %v290_v20  ;;  %v293_v33 = vsub.f32 0.75, %v291_v22  ;;  %v288_v35 = vsub.f32 %v256_v13, %v254_v1  ;;  %v296_v36 = vsub.f32 0.75, %v294_v23 }
  0x46   : > { %v264_v7 = vmul.f32 1.442695, %v262_v5  ;;  %v266_v8 = vmul.f32 1.442695, %v263_v6  ;;  %v289_v38 = vsub.f32 %v257_v16, %v255_v2  ;;  %v297_v39 = vsub.f32 0.75, %v295_v25 }
  0x47   : > { %v300_v42 = vmul.f32 %v292_v29, %v254_v1  ;;  %v301_v44 = vmul.f32 %v293_v33, %v255_v2  ;;  %v298_v45 = vmul.f32 %v288_v35, %v288_v35 }
  0x48   : > { %549 = vpow2.f32 %v264_v7  ;;  %v299_v47 = vmul.f32 %v289_v38, %v289_v38 }
  0x49   : > { %551 = vpow2.f32 %v266_v8 }
  0x4e   : > { %v550_v9 = vpop.eup %549 }
  0x4f   : > { %v552_v10 = vpop.eup %551  ;;  %v268_v11 = vadd.f32 1.0, %v550_v9  ;;  %v271_v12 = vmul.f32 -0.5, %v550_v9  ;;  %v274_v18 = vand.u32 2147483647, %v550_v9 }
  0x50   : > { %v277_v14 = vadd.f32 1.0, %v552_v10  ;;  %v280_v15 = vmul.f32 -0.5, %v552_v10  ;;  %v283_v21 = vand.u32 2147483647, %v552_v10 }
  0x51   : > { %553 = vlog2.f32 %v268_v11  ;;  %v272_v17 = vadd.f32 1.0, %v271_v12  ;;  %vm275_vm0 = vcmp.lt.f32.partialorder %v274_v18, 0.0004427343 }
  0x52   : > { %555 = vlog2.f32 %v277_v14  ;;  %v281_v19 = vadd.f32 1.0, %v280_v15  ;;  %vm284_vm1 = vcmp.lt.f32.partialorder %v283_v21, 0.0004427343 }
  0x53   : > { %v273_v24 = vmul.f32 %v550_v9, %v272_v17 }
  0x54   : > { %v282_v28 = vmul.f32 %v552_v10, %v281_v19 }
  0x57   : > { %v554_v26 = vpop.eup %553 }
  0x58   : > { %v556_v30 = vpop.eup %555  ;;  %v270_v32 = vmul.f32 0.6931472, %v554_v26 }
  0x59   : > { %v279_v34 = vmul.f32 0.6931472, %v556_v30 }
  0x5a   : > { %v276_v37 = vsel %vm275_vm0, %v273_v24, %v270_v32 }
  0x5b   : > { %v285_v40 = vsel %vm284_vm1, %v282_v28, %v279_v34  ;;  %v286_v41 = vsub.f32 %v258_v27, %v276_v37 }
  0x5c   : > { %v287_v43 = vsub.f32 %v259_v31, %v285_v40 }
  0x5d   : > { %v302_v46 = vmul.f32 %v296_v36, %v286_v41 }
  0x5e   : > { %v303_v48 = vmul.f32 %v297_v39, %v287_v43 }
  0x5f   : > { %v304_v49 = vsub.f32 %v300_v42, %v302_v46 }
  0x60   : > { %v305_v50 = vsub.f32 %v301_v44, %v303_v48 }
  0x61   : > { %v306_v51 = vmul.f32 %v304_v49, %v298_v45 }
  0x62   : > { %v307_v52 = vmul.f32 %v305_v50, %v299_v47 }
  0x64   : > { %v309_v54 = vadd.f32 %v307_v52, %v306_v51 }
  0x66   : > { %v310_v55 = vadd.f32 %v309_v54, %v308_v53 }
  0x68   : > { %311 = vst [vmem:[#allocation2] sm:$0xff] %v310_v55 }
  0x69 PF: > { %s450_s21 = sshll.u32 %s716_s14, 3  ;;  %s330_s6 = sshll.u32 %s235_s18, 4  ;;  %s331_s6 = int_to_ptr.vmem [resolvable:$true] %s330_s6 }
  0x6a   : > { %s328_s30 = scalar_lea.hbm %s928_s2, %s450_s21  ;;  %s318_s3 = scalar_lea.sflag [#allocation5], %s233_s4 }
  0x6b   : > { %s332_s29 = sshll.u32 %s328_s30, 4  ;;  %s637_s22 = scalar_lea.hbm %s928_s2, 16  ;;  %s333_s29 = int_to_ptr.hbm [resolvable:$true] %s332_s29 }
  0x6c   : > { %s631_s7 = sshra.s32 %s333_s29, 4  ;;  %s632_s7 = int_to_ptr.hbm [resolvable:$true] %s631_s7 }
  0x6d   : > { %s633_s8 = scalar_lea.hbm %s632_s7, 8  ;;  %p638_p11 = scmp.lt.s32.totalorder %s632_s7, %s928_s2 }
  0x6e   : > { %p634_p6 = scmp.ne.s32.totalorder %s632_s7, %s633_s8  ;;  %p639_p1 = scmp.lt.s32.totalorder %s637_s22, %s633_s8 }
  0x6f   : > { %v315_v56 = vld [vmem:[#allocation2] sm:$0xff] }
  0x70   : > { %316 = vst [vmem:[%s235_s18] sm:$0xff] %v315_v56  ;;  %p635_p8 = pnand %p634_p6, %p810_p12  ;;  %p640_p7 = por %p639_p1, %p638_p11 }
  0x72   : > { %p636_p4 = pneg %p635_p8 }
  0x74   : > { %p641_p9 = pnand %p640_p7, %p636_p4 }
  0x76   : > { %644 = shalt.err (!%p641_p9)
}
  0x77   : > { %459 = dma.vmem_to_hbm [thread:$0]  (%p810_p12), %s331_s6, 128, %s333_s29, %s318_s3  }
  0x78 PF: > { %s344_s5 = sand.u32 1, %s696_s9   ;;  %p469_p10 = pnand %p437_p13, %p815_p0 }
  0x79   : > { %s345_s4 = scalar_lea.sflag [#allocation5], %s344_s5 }
  0x7a   : > { %p470_p3 = pneg %p469_p10 }
  0x7c   : > { %690 = dma.done.wait (%p470_p3), %s345_s4, 128  }
  0x7d   : > { %692 = vsyncadd (%p470_p3), %s345_s4, 4294967168  ;;  %s21_s16 = sadd.s32 1, %s724_s16   ;;  %s935_s9 = smov %s700_s10 }
  0x7e   : > { %p18_p5 = scmp.ge.s32.totalorder %s21_s16, 4   ;;  %s936_s10 = smov %s704_s11 }
  0x7f   : > { %s937_s11 = smov %s804_s24  ;;  %s938_s12 = smov %s712_s13 }
  0x80   : > { %s916_s13 = smov 0   ;;  %s939_s14 = smov %s720_s15 }
  0x81   : > { %s940_s15 = smov %s942_s19  ;;  %20 = sbr.rel (!%p18_p5) target bundleno = 9 (0x9), region = 98 }
  0x86   :  { %351 = vsyncpa [#allocation4], 1 }
  0x87   :  { %353 = vsyncpa [#allocation4 + $0x1], 1 }
  0x88   :  { %354 = vsyncpa [#allocation7], 1 }
  0x89   :  { %356 = vsyncpa [#allocation7 + $0x1], 1 }
  0x8a   :  { %357 = vsyncpa [#allocation5], 1 }
  0x8b   :  { %359 = vsyncpa [#allocation5 + $0x1], 1 }

</bundles_post_ra>
